<compile_context>
chip_gen: v5e
topology: v5e:2x2
jax: 0.10.0
libtpu: 0.0.40
codegen_flags: <defaults>
</compile_context>

<pallas_src>
import functools

import jax
import jax.numpy as jnp
from jax import lax
from jax.experimental import pallas as pl
from jax.experimental.pallas import tpu as pltpu


def _dprnn_kernel(x_ref, wih_ref, whh_ref, b_ref, wout_ref, bout_ref, out_ref,
                  *, seq_len, hidden):
    """One batch-tile: bulk input projection -> unrolled recurrence -> bulk head."""
    T = seq_len
    tb = x_ref.shape[1]          # batch tile (x is time-major: (T, TB, I))
    in_dim = x_ref.shape[2]
    out_dim = out_ref.shape[2]

    # ---- Load weights / biases once (never inside the serial chain). ----
    wih = wih_ref[...]           # (I, H)
    whh = whh_ref[...]           # (H, H)
    wout = wout_ref[...]         # (H, O)
    bias = b_ref[...]            # (1, H)  = b_ih + b_hh
    bout = bout_ref[...]         # (1, O)

    # ---- Hoisted input projection: one bulk matmul, biases folded in. ----
    # (T, TB, I) -> (T*TB, I): collapse leading dim into sublanes (no-op relayout).
    x2d = x_ref[...].reshape(T * tb, in_dim)
    xp = jnp.dot(x2d, wih, preferred_element_type=jnp.float32) + bias   # (T*TB, H)

    # ---- Recurrent chain: only h @ Whh^T + tanh per step, fully unrolled. ----
    # NOTE: at H=20 the per-step matmul is tiny; kept on the MXU for simplicity —
    # the chain is latency-bound either way and unrolling lets steps interleave.
    h = jnp.zeros((tb, hidden), jnp.float32)
    hs = []
    for t in range(T):
        xp_t = xp[t * tb:(t + 1) * tb, :]                 # aligned static slice
        h = jnp.tanh(xp_t + jnp.dot(h, whh, preferred_element_type=jnp.float32))
        hs.append(h)
    hs_all = jnp.concatenate(hs, axis=0)                  # (T*TB, H), time-major

    # ---- Hoisted output head + single slab store (dropout = identity, eval). ----
    y = jnp.dot(hs_all, wout, preferred_element_type=jnp.float32) + bout  # (T*TB, O)
    out_ref[...] = y.reshape(T, tb, out_dim).astype(out_ref.dtype)


def dprnn_forward(x, w_ih, w_hh, b_ih, b_hh, w_out, b_out, *, batch_tile=None):
    """x: (B, T, I) float32.  Returns (B, T, O)."""
    B, T, I = x.shape
    H = w_ih.shape[0]
    O = w_out.shape[0]
    if batch_tile is None:
        # Single grid step: best on single-TC v5e/v6e (extra grid steps are pure
        # serial overhead at these sizes). On v7x with a large batch, pass
        # batch_tile=B//2 so the "parallel" axis shards across both TensorCores.
        batch_tile = B
    assert B % batch_tile == 0

    # Time-major layout for the kernel; weights pre-transposed; biases folded.
    x_tbi = jnp.swapaxes(jnp.asarray(x, jnp.float32), 0, 1)   # (T, B, I)
    wih_t = jnp.asarray(w_ih.T, jnp.float32)                  # (I, H)
    whh_t = jnp.asarray(w_hh.T, jnp.float32)                  # (H, H)
    b = jnp.asarray(b_ih + b_hh, jnp.float32)[None]           # (1, H)
    wout_t = jnp.asarray(w_out.T, jnp.float32)                # (H, O)
    bout = jnp.asarray(b_out, jnp.float32)[None]              # (1, O)

    kernel = functools.partial(_dprnn_kernel, seq_len=T, hidden=H)

    grid = (B // batch_tile,)
    out_tbo = pl.pallas_call(
        kernel,
        out_shape=jax.ShapeDtypeStruct((T, B, O), jnp.float32),
        grid_spec=pltpu.PrefetchScalarGridSpec(
            num_scalar_prefetch=0,
            grid=grid,
            in_specs=[
                pl.BlockSpec((T, batch_tile, I), lambda i: (0, i, 0)),
                pl.BlockSpec((I, H), lambda i: (0, 0)),
                pl.BlockSpec((H, H), lambda i: (0, 0)),
                pl.BlockSpec((1, H), lambda i: (0, 0)),
                pl.BlockSpec((H, O), lambda i: (0, 0)),
                pl.BlockSpec((1, O), lambda i: (0, 0)),
            ],
            out_specs=pl.BlockSpec((T, batch_tile, O), lambda i: (0, i, 0)),
        ),
        compiler_params=pltpu.CompilerParams(
            dimension_semantics=("parallel",)),
    )(x_tbi, wih_t, whh_t, b, wout_t, bout)
    return jnp.swapaxes(out_tbo, 0, 1)                        # (B, T, O)


def dprnn_reference(x, w_ih, w_hh, b_ih, b_hh, w_out, b_out):
    """Pure-JAX reference mirroring torch.nn.RNN(batch_first=True) + Linear."""
    B, T, I = x.shape
    H = w_ih.shape[0]

    def step(h, x_t):
        h_new = jnp.tanh(x_t @ w_ih.T + b_ih + h @ w_hh.T + b_hh)
        return h_new, h_new

    x_tbi = jnp.swapaxes(x, 0, 1)                              # (T, B, I)
    _, hs = lax.scan(step, jnp.zeros((B, H), jnp.float32), x_tbi)
    r_out = jnp.swapaxes(hs, 0, 1)                             # (B, T, H)
    return r_out @ w_out.T + b_out


if __name__ == "__main__":
    # Module defaults: input_size=2, hidden=20, output_size=2, n_layers=1.
    B, T, I, H, O = 8, 8, 2, 20, 2

    key = jax.random.PRNGKey(0)
    ks = jax.random.split(key, 8)
    bound = 1.0 / jnp.sqrt(jnp.float32(H))                     # PyTorch init scale

    x = jax.random.normal(ks[0], (B, T, I), jnp.float32)
    w_ih = jax.random.uniform(ks[1], (H, I), jnp.float32, -bound, bound)
    w_hh = jax.random.uniform(ks[2], (H, H), jnp.float32, -bound, bound)
    b_ih = jax.random.uniform(ks[3], (H,), jnp.float32, -bound, bound)
    b_hh = jax.random.uniform(ks[4], (H,), jnp.float32, -bound, bound)
    w_out = jax.random.uniform(ks[5], (O, H), jnp.float32, -bound, bound)
    b_out = jax.random.uniform(ks[6], (O,), jnp.float32, -bound, bound)

    out = dprnn_forward(x, w_ih, w_hh, b_ih, b_hh, w_out, b_out)
    out = jax.block_until_ready(out)

    ref = dprnn_reference(x, w_ih, w_hh, b_ih, b_hh, w_out, b_out)
    assert out.shape == (B, T, O)
    assert jnp.allclose(out, ref, atol=1e-5, rtol=1e-5), "mismatch vs reference"

    print("KERNEL_OK")
</pallas_src>

<mosaic_0001>
module attributes {stable_mosaic.version = 11 : i64} {
  func.func @_dprnn_kernel(%arg0: i32, %arg1: memref<8x8x2xf32, #tpu.memory_space<vmem>>, %arg2: memref<2x20xf32, #tpu.memory_space<vmem>>, %arg3: memref<20x20xf32, #tpu.memory_space<vmem>>, %arg4: memref<1x20xf32, #tpu.memory_space<vmem>>, %arg5: memref<20x2xf32, #tpu.memory_space<vmem>>, %arg6: memref<1x2xf32, #tpu.memory_space<vmem>>, %arg7: memref<8x8x2xf32, #tpu.memory_space<vmem>>) attributes {dimension_semantics = [#tpu.dimension_semantics<parallel>], iteration_bounds = array<i64: 1>, scalar_prefetch = 0 : i64, scratch_operands = 0 : i64, tpu.core_type = #tpu.core_type<tc>, window_params = [{transform_indices = @transform_0, window_bounds = array<i64: 8, 8, 2>}, {pipeline_mode = #tpu.pipeline_mode<synchronous>, transform_indices = @transform_1, window_bounds = array<i64: 2, 20>}, {pipeline_mode = #tpu.pipeline_mode<synchronous>, transform_indices = @transform_2, window_bounds = array<i64: 20, 20>}, {pipeline_mode = #tpu.pipeline_mode<synchronous>, transform_indices = @transform_3, window_bounds = array<i64: 1, 20>}, {pipeline_mode = #tpu.pipeline_mode<synchronous>, transform_indices = @transform_4, window_bounds = array<i64: 20, 2>}, {pipeline_mode = #tpu.pipeline_mode<synchronous>, transform_indices = @transform_5, window_bounds = array<i64: 1, 2>}, {transform_indices = @transform_6, window_bounds = array<i64: 8, 8, 2>}]} {
    %c0 = arith.constant 0 : index
    %c0_0 = arith.constant 0 : index
    %0 = vector.load %arg2[%c0, %c0_0] : memref<2x20xf32, #tpu.memory_space<vmem>>, vector<2x20xf32>
    %c0_1 = arith.constant 0 : index
    %c0_2 = arith.constant 0 : index
    %1 = vector.load %arg3[%c0_1, %c0_2] : memref<20x20xf32, #tpu.memory_space<vmem>>, vector<20x20xf32>
    %c0_3 = arith.constant 0 : index
    %c0_4 = arith.constant 0 : index
    %2 = vector.load %arg5[%c0_3, %c0_4] : memref<20x2xf32, #tpu.memory_space<vmem>>, vector<20x2xf32>
    %c0_5 = arith.constant 0 : index
    %c0_6 = arith.constant 0 : index
    %3 = vector.load %arg4[%c0_5, %c0_6] : memref<1x20xf32, #tpu.memory_space<vmem>>, vector<1x20xf32>
    %c0_7 = arith.constant 0 : index
    %c0_8 = arith.constant 0 : index
    %4 = vector.load %arg6[%c0_7, %c0_8] : memref<1x2xf32, #tpu.memory_space<vmem>>, vector<1x2xf32>
    %c0_9 = arith.constant 0 : index
    %c0_10 = arith.constant 0 : index
    %c0_11 = arith.constant 0 : index
    %5 = vector.load %arg1[%c0_9, %c0_10, %c0_11] : memref<8x8x2xf32, #tpu.memory_space<vmem>>, vector<8x8x2xf32>
    %6 = vector.shape_cast %5 : vector<8x8x2xf32> to vector<64x2xf32>
    %cst = arith.constant dense<0.000000e+00> : vector<64x20xf32>
    %7 = tpu.matmul %6, %0, %cst {dimension_numbers = #tpu.dot_dimension_numbers<[1], [0], [0], [1], [0, 0, 1, 1], [], []>} : vector<64x2xf32>, vector<2x20xf32>, vector<64x20xf32> -> vector<64x20xf32>
    %8 = vector.broadcast %3 : vector<1x20xf32> to vector<64x20xf32>
    %9 = arith.addf %7, %8 : vector<64x20xf32>
    %cst_12 = arith.constant 0.000000e+00 : f32
    %10 = vector.broadcast %cst_12 : f32 to vector<8x20xf32>
    %11 = vector.extract_strided_slice %9 {offsets = [0, 0], sizes = [8, 20], strides = [1, 1]} : vector<64x20xf32> to vector<8x20xf32>
    %cst_13 = arith.constant dense<0.000000e+00> : vector<8x20xf32>
    %12 = tpu.matmul %10, %1, %cst_13 {dimension_numbers = #tpu.dot_dimension_numbers<[1], [0], [0], [1], [0, 0, 1, 1], [], []>} : vector<8x20xf32>, vector<20x20xf32>, vector<8x20xf32> -> vector<8x20xf32>
    %13 = arith.addf %11, %12 : vector<8x20xf32>
    %14 = math.tanh %13 : vector<8x20xf32>
    %15 = vector.extract_strided_slice %9 {offsets = [8, 0], sizes = [8, 20], strides = [1, 1]} : vector<64x20xf32> to vector<8x20xf32>
    %cst_14 = arith.constant dense<0.000000e+00> : vector<8x20xf32>
    %16 = tpu.matmul %14, %1, %cst_14 {dimension_numbers = #tpu.dot_dimension_numbers<[1], [0], [0], [1], [0, 0, 1, 1], [], []>} : vector<8x20xf32>, vector<20x20xf32>, vector<8x20xf32> -> vector<8x20xf32>
    %17 = arith.addf %15, %16 : vector<8x20xf32>
    %18 = math.tanh %17 : vector<8x20xf32>
    %19 = vector.extract_strided_slice %9 {offsets = [16, 0], sizes = [8, 20], strides = [1, 1]} : vector<64x20xf32> to vector<8x20xf32>
    %cst_15 = arith.constant dense<0.000000e+00> : vector<8x20xf32>
    %20 = tpu.matmul %18, %1, %cst_15 {dimension_numbers = #tpu.dot_dimension_numbers<[1], [0], [0], [1], [0, 0, 1, 1], [], []>} : vector<8x20xf32>, vector<20x20xf32>, vector<8x20xf32> -> vector<8x20xf32>
    %21 = arith.addf %19, %20 : vector<8x20xf32>
    %22 = math.tanh %21 : vector<8x20xf32>
    %23 = vector.extract_strided_slice %9 {offsets = [24, 0], sizes = [8, 20], strides = [1, 1]} : vector<64x20xf32> to vector<8x20xf32>
    %cst_16 = arith.constant dense<0.000000e+00> : vector<8x20xf32>
    %24 = tpu.matmul %22, %1, %cst_16 {dimension_numbers = #tpu.dot_dimension_numbers<[1], [0], [0], [1], [0, 0, 1, 1], [], []>} : vector<8x20xf32>, vector<20x20xf32>, vector<8x20xf32> -> vector<8x20xf32>
    %25 = arith.addf %23, %24 : vector<8x20xf32>
    %26 = math.tanh %25 : vector<8x20xf32>
    %27 = vector.extract_strided_slice %9 {offsets = [32, 0], sizes = [8, 20], strides = [1, 1]} : vector<64x20xf32> to vector<8x20xf32>
    %cst_17 = arith.constant dense<0.000000e+00> : vector<8x20xf32>
    %28 = tpu.matmul %26, %1, %cst_17 {dimension_numbers = #tpu.dot_dimension_numbers<[1], [0], [0], [1], [0, 0, 1, 1], [], []>} : vector<8x20xf32>, vector<20x20xf32>, vector<8x20xf32> -> vector<8x20xf32>
    %29 = arith.addf %27, %28 : vector<8x20xf32>
    %30 = math.tanh %29 : vector<8x20xf32>
    %31 = vector.extract_strided_slice %9 {offsets = [40, 0], sizes = [8, 20], strides = [1, 1]} : vector<64x20xf32> to vector<8x20xf32>
    %cst_18 = arith.constant dense<0.000000e+00> : vector<8x20xf32>
    %32 = tpu.matmul %30, %1, %cst_18 {dimension_numbers = #tpu.dot_dimension_numbers<[1], [0], [0], [1], [0, 0, 1, 1], [], []>} : vector<8x20xf32>, vector<20x20xf32>, vector<8x20xf32> -> vector<8x20xf32>
    %33 = arith.addf %31, %32 : vector<8x20xf32>
    %34 = math.tanh %33 : vector<8x20xf32>
    %35 = vector.extract_strided_slice %9 {offsets = [48, 0], sizes = [8, 20], strides = [1, 1]} : vector<64x20xf32> to vector<8x20xf32>
    %cst_19 = arith.constant dense<0.000000e+00> : vector<8x20xf32>
    %36 = tpu.matmul %34, %1, %cst_19 {dimension_numbers = #tpu.dot_dimension_numbers<[1], [0], [0], [1], [0, 0, 1, 1], [], []>} : vector<8x20xf32>, vector<20x20xf32>, vector<8x20xf32> -> vector<8x20xf32>
    %37 = arith.addf %35, %36 : vector<8x20xf32>
    %38 = math.tanh %37 : vector<8x20xf32>
    %39 = vector.extract_strided_slice %9 {offsets = [56, 0], sizes = [8, 20], strides = [1, 1]} : vector<64x20xf32> to vector<8x20xf32>
    %cst_20 = arith.constant dense<0.000000e+00> : vector<8x20xf32>
    %40 = tpu.matmul %38, %1, %cst_20 {dimension_numbers = #tpu.dot_dimension_numbers<[1], [0], [0], [1], [0, 0, 1, 1], [], []>} : vector<8x20xf32>, vector<20x20xf32>, vector<8x20xf32> -> vector<8x20xf32>
    %41 = arith.addf %39, %40 : vector<8x20xf32>
    %42 = math.tanh %41 : vector<8x20xf32>
    %43 = tpu.concatenate %14, %18, %22, %26, %30, %34, %38, %42 in 0 : vector<8x20xf32>, vector<8x20xf32>, vector<8x20xf32>, vector<8x20xf32>, vector<8x20xf32>, vector<8x20xf32>, vector<8x20xf32>, vector<8x20xf32> -> vector<64x20xf32>
    %cst_21 = arith.constant dense<0.000000e+00> : vector<64x2xf32>
    %44 = tpu.matmul %43, %2, %cst_21 {dimension_numbers = #tpu.dot_dimension_numbers<[1], [0], [0], [1], [0, 0, 1, 1], [], []>} : vector<64x20xf32>, vector<20x2xf32>, vector<64x2xf32> -> vector<64x2xf32>
    %45 = vector.broadcast %4 : vector<1x2xf32> to vector<64x2xf32>
    %46 = arith.addf %44, %45 : vector<64x2xf32>
    %47 = vector.shape_cast %46 : vector<64x2xf32> to vector<8x8x2xf32>
    %c0_22 = arith.constant 0 : index
    %c0_23 = arith.constant 0 : index
    %c0_24 = arith.constant 0 : index
    %48 = vector.load %arg7[%c0_22, %c0_23, %c0_24] : memref<8x8x2xf32, #tpu.memory_space<vmem>>, vector<8x8x2xf32>
    tpu.vector_store %arg7[%c0_22, %c0_23, %c0_24], %47 {strides = array<i32>} : memref<8x8x2xf32, #tpu.memory_space<vmem>>, vector<8x8x2xf32>,
    return
  }
  func.func @transform_0(%arg0: i32) -> (i32, i32, i32) {
    %c0_i32 = arith.constant 0 : i32
    %c0_i32_0 = arith.constant 0 : i32
    %c0_i32_1 = arith.constant 0 : i32
    return %c0_i32, %arg0, %c0_i32_0 : i32, i32, i32
  }
  func.func @transform_1(%arg0: i32) -> (i32, i32) {
    %c0_i32 = arith.constant 0 : i32
    %c0_i32_0 = arith.constant 0 : i32
    %c0_i32_1 = arith.constant 0 : i32
    return %c0_i32, %c0_i32_0 : i32, i32
  }
  func.func @transform_2(%arg0: i32) -> (i32, i32) {
    %c0_i32 = arith.constant 0 : i32
    %c0_i32_0 = arith.constant 0 : i32
    %c0_i32_1 = arith.constant 0 : i32
    return %c0_i32, %c0_i32_0 : i32, i32
  }
  func.func @transform_3(%arg0: i32) -> (i32, i32) {
    %c0_i32 = arith.constant 0 : i32
    %c0_i32_0 = arith.constant 0 : i32
    %c0_i32_1 = arith.constant 0 : i32
    return %c0_i32, %c0_i32_0 : i32, i32
  }
  func.func @transform_4(%arg0: i32) -> (i32, i32) {
    %c0_i32 = arith.constant 0 : i32
    %c0_i32_0 = arith.constant 0 : i32
    %c0_i32_1 = arith.constant 0 : i32
    return %c0_i32, %c0_i32_0 : i32, i32
  }
  func.func @transform_5(%arg0: i32) -> (i32, i32) {
    %c0_i32 = arith.constant 0 : i32
    %c0_i32_0 = arith.constant 0 : i32
    %c0_i32_1 = arith.constant 0 : i32
    return %c0_i32, %c0_i32_0 : i32, i32
  }
  func.func @transform_6(%arg0: i32) -> (i32, i32, i32) {
    %c0_i32 = arith.constant 0 : i32
    %c0_i32_0 = arith.constant 0 : i32
    %c0_i32_1 = arith.constant 0 : i32
    return %c0_i32, %arg0, %c0_i32_0 : i32, i32, i32
  }
}

</mosaic_0001>

<bundles_post_ra>
// kernel: tpu_custom_call.1
= control target key start
LH: loop header
LB: loop body
LE: loop exit
PB: predicated region body
PF: predicated region fallthrough
CT: control target
= control target key end

     0   :  { %vm68_vm0 = vcmask 1041408   ;;  %vm43_vm1 = vcmask 15360   ;;  %vm117_vm2 = vcmask 1043456   ;;  %v436_v6 = vmov 0.0   ;;  %s605_s1 = inlined_call_operand.vmem [shape: f32[2,20], index: 1, kind: input, shape index: {}]   ;;  %s606_s0 = inlined_call_operand.vmem [shape: f32[8,8,2], index: 0, kind: input, shape index: {}]   ;;  %s607_s2 = inlined_call_operand.vmem [shape: f32[20,20], index: 2, kind: input, shape index: {}]   ;;  %s608_s3 = inlined_call_operand.vmem [shape: f32[1,20], index: 3, kind: input, shape index: {}]   ;;  %s609_s4 = inlined_call_operand.vmem [shape: f32[20,2], index: 4, kind: input, shape index: {}]   ;;  %s610_s5 = inlined_call_operand.vmem [shape: f32[1,2], index: 5, kind: input, shape index: {}]   ;;  %s611_s6 = inlined_call_operand.vmem [shape: f32[8,8,2], index: 6, kind: output, shape index: {}]  }
   0x1   :  { %v23_v0 = vld [vmem:[%s605_s1] sm:$0x3]  ;;  %v39_v1 = vld [vmem:[%s606_s0 + $0x38] sm:$0xff]  ;;  %v26_v2 = vld [vmem:[%s607_s2 + $0x10] sm:$0xf]  ;;  %vm113_vm3 = vcmask 162816  }
   0x2   :  { %413 = vmatpush.msk.msra.mxu2 %vm68_vm0, %v23_v0  ;;  %380 = vmatpush.msk.msra.mxu0 %vm68_vm0, %v23_v0  ;;  %v32_v3 = vld [vmem:[%s606_s0] sm:$0xff]  ;;  %v25_v4 = vld [vmem:[%s607_s2 + $0x8] sm:$0xff]  ;;  %v34_v15 = vld [vmem:[%s606_s0 + $0x10] sm:$0xff] }
   0x3   :  { %388 = vmatmul.msk.f32.vlgmr.msra.gmra.mxu2 %vm43_vm1, %v39_v1  ;;  %381 = vmatmul.msk.f32.vlgmr.msra.gmra.mxu0 %vm43_vm1, %v32_v3  ;;  %v24_v5 = vld [vmem:[%s607_s2] sm:$0xff]  ;;  %v33_v7 = vld [vmem:[%s606_s0 + $0x8] sm:$0xff]  ;;  %v35_v21 = vld [vmem:[%s606_s0 + $0x18] sm:$0xff] }
   0x4   :  { %389 = vmatpush.msk.msrb.mxu2 %vm117_vm2, %v26_v2  ;;  %392 = vmatpush.msk.msra.mxu3 %vm117_vm2, %v26_v2  ;;  %v508_v10 = vld [vmem:[%s608_s3] ss:$0 sm:$0xff]  ;;  %v29_v33 = vld [vmem:[%s609_s4 + $0x10] sm:$0xf]  ;;  %v37_v34 = vld [vmem:[%s606_s0 + $0x28] sm:$0xff] }
   0x5   :  { %394 = vmatpush.msk.msra.mxu1 %vm117_vm2, %v26_v2  ;;  %v36_v27 = vld [vmem:[%s606_s0 + $0x20] sm:$0xff]  ;;  %v28_v35 = vld [vmem:[%s609_s4 + $0x8] sm:$0xff]  ;;  %v38_v42 = vld [vmem:[%s606_s0 + $0x30] sm:$0xff] }
   0x6   :  { %135 = vmatpush.msrb.mxu2 %v25_v4  ;;  %185 = vmatpush.msra.mxu3 %v25_v4  ;;  %v27_v36 = vld [vmem:[%s609_s4] sm:$0xff] }
   0x7   :  { %210 = vmatpush.msra.mxu1 %v25_v4  ;;  %v419_v47 = vld [vmem:[%s610_s5] ss:$0 sm:$0xff] }
   0x8   :  { %136 = vmatpush.msrb.mxu2 %v24_v5  ;;  %186 = vmatpush.msra.mxu3 %v24_v5 }
   0x9   :  { %211 = vmatpush.msra.mxu1 %v24_v5 }
   0xa   :  { %390 = vmatpush.msk.msra.mxu2 %vm117_vm2, %v26_v2  ;;  %398 = vmatpush.msk.msrb.mxu3 %vm117_vm2, %v26_v2 }
   0xb   :  { %400 = vmatpush.msk.msrb.mxu1 %vm117_vm2, %v26_v2  ;;  %137 = vmatmul.f32.vlgmr.msrb.gmra.mxu2 %v436_v6 }
   0xc   :  { %160 = vmatpush.msra.mxu2 %v25_v4  ;;  %260 = vmatpush.msrb.mxu3 %v25_v4 }
   0xd   :  { %285 = vmatpush.msrb.mxu1 %v25_v4  ;;  %382 = vmatmul.msk.f32.gmra.mxu0 %vm43_vm1, %v33_v7 }
   0xe   :  { %161 = vmatpush.msra.mxu2 %v24_v5  ;;  %261 = vmatpush.msrb.mxu3 %v24_v5 }
   0xf   :  { %286 = vmatpush.msrb.mxu1 %v24_v5 }
  0x10   :  { %396 = vmatpush.msk.msrb.mxu2 %vm117_vm2, %v26_v2 }
  0x12   :  { %235 = vmatpush.msrb.mxu2 %v25_v4 }
  0x14   :  { %236 = vmatpush.msrb.mxu2 %v24_v5 }
  0x15   :  { %383 = vmatmul.msk.f32.gmra.mxu0 %vm43_vm1, %v34_v15 }
  0x1d   :  { %384 = vmatmul.msk.f32.gmra.mxu0 %vm43_vm1, %v35_v21 }
  0x25   :  { %385 = vmatmul.msk.f32.gmra.mxu0 %vm43_vm1, %v36_v27 }
  0x2d   :  { %386 = vmatmul.msk.f32.gmra.mxu0 %vm43_vm1, %v37_v34 }
  0x35   :  { %387 = vmatmul.msk.f32.gmra.mxu0 %vm43_vm1, %v38_v42 }
  0x80   :  { %v89_v9 = vpop.f32.mrf.mxu0 }
  0x81   :  { %v90_v11 = vadd.f32 %v508_v10, %v89_v9 }
  0x86   :  { %v503_v8 = vpop.f32.mrf.mxu2 }
  0x8a   :  { %v92_v16 = vpop.f32.mrf.mxu0 }
  0x8b   :  { %v93_v17 = vadd.f32 %v508_v10, %v92_v16 }
  0x8e   :  { %v138_v12 = vpop.f32.mrf.mxu2 }
  0x8f   :  { %v141_v13 = vadd.f32 %v138_v12, %v90_v11 }
  0x91   :  { %420 = vtanh.f32 %v141_v13 }
  0x92   :  { %v95_v22 = vpop.f32.mrf.mxu0 }
  0x93   :  { %v96_v23 = vadd.f32 %v508_v10, %v95_v22 }
  0x97   :  { %v511_v14 = vpop.eup %420 }
  0x98   :  { %391 = vmatmul.msk.f32.vlgmr.msra.gmra.mxu2 %vm113_vm3, %v511_v14 }
  0x99   :  { %402 = vmatpush.msk.msra.mxu2 %vm117_vm2, %v26_v2  ;;  %v111_v2 = vadd.f32 %v508_v10, %v503_v8 }
  0x9a   :  { %v98_v28 = vpop.f32.mrf.mxu0 }
  0x9b   :  { %310 = vmatpush.msra.mxu2 %v25_v4  ;;  %v99_v29 = vadd.f32 %v508_v10, %v98_v28 }
  0x9d   :  { %311 = vmatpush.msra.mxu2 %v24_v5 }
  0xa2   :  { %v101_v37 = vpop.f32.mrf.mxu0 }
  0xa3   :  { %v102_v38 = vadd.f32 %v508_v10, %v101_v37 }
  0xaa   :  { %v104_v43 = vpop.f32.mrf.mxu0 }
  0xab   :  { %v105_v44 = vadd.f32 %v508_v10, %v104_v43 }
  0xb2   :  { %v107_v51 = vpop.f32.mrf.mxu0 }
  0xb3   :  { %v108_v52 = vadd.f32 %v508_v10, %v107_v51 }
 0x11b   :  { %v163_v18 = vpop.f32.mrf.mxu2 }
 0x11c   :  { %v166_v19 = vadd.f32 %v163_v18, %v93_v17 }
 0x11e   :  { %422 = vtanh.f32 %v166_v19 }
 0x124   :  { %v423_v20 = vpop.eup %422 }
 0x125   :  { %393 = vmatmul.msk.f32.vlgmr.msra.gmra.mxu3 %vm113_vm3, %v423_v20 }
 0x126   :  { %414 = vmatpush.msk.msra.mxu3 %vm117_vm2, %v29_v33 }
 0x128   :  { %415 = vmatpush.msra.mxu3 %v28_v35 }
 0x12a   :  { %416 = vmatpush.msra.mxu3 %v27_v36 }
 0x1a8   :  { %v188_v24 = vpop.f32.mrf.mxu3 }
 0x1a9   :  { %v191_v25 = vadd.f32 %v188_v24, %v96_v23 }
 0x1ab   :  { %424 = vtanh.f32 %v191_v25 }
 0x1b1   :  { %v425_v26 = vpop.eup %424 }
 0x1b2   :  { %395 = vmatmul.msk.f32.vlgmr.msra.gmra.mxu1 %vm113_vm3, %v425_v26 }
 0x1b3   :  { %404 = vmatpush.msk.msra.mxu1 %vm117_vm2, %v29_v33 }
 0x1b5   :  { %341 = vmatpush.msra.mxu1 %v28_v35 }
 0x1b7   :  { %342 = vmatpush.msra.mxu1 %v27_v36 }
 0x22f   :  { %v213_v30 = vpop.f32.mrf.mxu1 }
 0x230   :  { %v216_v31 = vadd.f32 %v213_v30, %v99_v29 }
 0x232   :  { %426 = vtanh.f32 %v216_v31 }
 0x238   :  { %v427_v32 = vpop.eup %426 }
 0x239   :  { %397 = vmatmul.msk.f32.vlgmr.msrb.gmra.mxu2 %vm113_vm3, %v427_v32 }
 0x2bc   :  { %v238_v39 = vpop.f32.mrf.mxu2 }
 0x2bd   :  { %v241_v40 = vadd.f32 %v238_v39, %v102_v38 }
 0x2bf   :  { %428 = vtanh.f32 %v241_v40 }
 0x2c5   :  { %v429_v41 = vpop.eup %428 }
 0x2c6   :  { %399 = vmatmul.msk.f32.vlgmr.msrb.gmra.mxu3 %vm113_vm3, %v429_v41 }
 0x2ce   :  { %409 = vmatmul.msk.f32.vlgmr.msra.gmra.mxu3 %vm113_vm3, %v429_v41 }
 0x349   :  { %v263_v45 = vpop.f32.mrf.mxu3 }
 0x34a   :  { %v266_v46 = vadd.f32 %v263_v45, %v105_v44 }
 0x34c   :  { %430 = vtanh.f32 %v266_v46 }
 0x351   :  { %v356_v48 = vpop.f32.mrf.mxu3 }
 0x352   :  { %v431_v49 = vpop.eup %430  ;;  %v357_v50 = vadd.f32 %v419_v47, %v356_v48 }
 0x353   :  { %401 = vmatmul.msk.f32.vlgmr.msrb.gmra.mxu1 %vm113_vm3, %v431_v49  ;;  %410 = vmatmul.msk.f32.gmra.mxu3 %vm113_vm3, %v431_v49 }
 0x354   :  { %372 = vst.msk [vmem:[%s611_s6 + $0x20] sm:$0xff] %vm43_vm1, %v357_v50 }
 0x35b   :  { %405 = vmatmul.msk.f32.vlgmr.msra.gmra.mxu1 %vm113_vm3, %v511_v14 }
 0x363   :  { %406 = vmatmul.msk.f32.gmra.mxu1 %vm113_vm3, %v423_v20 }
 0x36b   :  { %407 = vmatmul.msk.f32.gmra.mxu1 %vm113_vm3, %v425_v26 }
 0x373   :  { %408 = vmatmul.msk.f32.gmra.mxu1 %vm113_vm3, %v427_v32 }
 0x3d0   :  { %v288_v53 = vpop.f32.mrf.mxu1 }
 0x3d1   :  { %v291_v54 = vadd.f32 %v288_v53, %v108_v52 }
 0x3d3   :  { %432 = vtanh.f32 %v291_v54 }
 0x3d6   :  { %v359_v55 = vpop.f32.mrf.mxu3 }
 0x3d7   :  { %v360_v56 = vadd.f32 %v419_v47, %v359_v55 }
 0x3d8   :  { %v344_v57 = vpop.f32.mrf.mxu1 }
 0x3d9   :  { %v433_v58 = vpop.eup %432  ;;  %373 = vst.msk [vmem:[%s611_s6 + $0x28] sm:$0xff] %vm43_vm1, %v360_v56  ;;  %v345_v59 = vadd.f32 %v419_v47, %v344_v57 }
 0x3da   :  { %403 = vmatmul.msk.f32.vlgmr.msra.gmra.mxu2 %vm113_vm3, %v433_v58  ;;  %411 = vmatmul.msk.f32.gmra.mxu3 %vm113_vm3, %v433_v58 }
 0x3db   :  { %368 = vst.msk [vmem:[%s611_s6] sm:$0xff] %vm43_vm1, %v345_v59 }
 0x3e0   :  { %v347_v60 = vpop.f32.mrf.mxu1 }
 0x3e1   :  { %v348_v61 = vadd.f32 %v419_v47, %v347_v60 }
 0x3e3   :  { %369 = vst.msk [vmem:[%s611_s6 + $0x8] sm:$0xff] %vm43_vm1, %v348_v61 }
 0x3e8   :  { %v350_v62 = vpop.f32.mrf.mxu1 }
 0x3e9   :  { %v351_v63 = vadd.f32 %v419_v47, %v350_v62 }
 0x3eb   :  { %370 = vst.msk [vmem:[%s611_s6 + $0x10] sm:$0xff] %vm43_vm1, %v351_v63 }
 0x3f0   :  { %v353_v0 = vpop.f32.mrf.mxu1 }
 0x3f1   :  { %v354_v1 = vadd.f32 %v419_v47, %v353_v0 }
 0x3f3   :  { %371 = vst.msk [vmem:[%s611_s6 + $0x18] sm:$0xff] %vm43_vm1, %v354_v1 }
 0x45d   :  { %v313_v3 = vpop.f32.mrf.mxu2  ;;  %v362_v4 = vpop.f32.mrf.mxu3 }
 0x45e   :  { %v316_v5 = vadd.f32 %v313_v3, %v111_v2  ;;  %v363_v6 = vadd.f32 %v419_v47, %v362_v4 }
 0x460   :  { %434 = vtanh.f32 %v316_v5  ;;  %374 = vst.msk [vmem:[%s611_s6 + $0x30] sm:$0xff] %vm43_vm1, %v363_v6 }
 0x466   :  { %v435_v7 = vpop.eup %434 }
 0x467   :  { %412 = vmatmul.msk.f32.gmra.mxu3 %vm113_vm3, %v435_v7 }
 0x4ea   :  { %v365_v9 = vpop.f32.mrf.mxu3 }
 0x4eb   :  { %v366_v11 = vadd.f32 %v419_v47, %v365_v9 }
 0x4ed   :  { %375 = vst.msk [vmem:[%s611_s6 + $0x38] sm:$0xff] %vm43_vm1, %v366_v11 }

</bundles_post_ra>
